<compile_context>
chip_gen: v7x
topology: tpu7x:2x2x1
jax: 0.10.0
libtpu: 0.0.40
codegen_flags: <defaults>
</compile_context>

<pallas_src>
import functools

import jax
import jax.numpy as jnp
from jax.experimental import pallas as pl
from jax.experimental.pallas import tpu as pltpu


def _round_up(x, m):
    return ((x + m - 1) // m) * m


def _focal_loss_kernel(logits_ref, targets_ref, out_ref, *,
                       alpha, gamma, reduction, n_valid, tile_n):
    i = pl.program_id(0)

    x = logits_ref[...].astype(jnp.float32)            # (TILE_N, C)
    t = targets_ref[...]                                # (TILE_N, 1) int32

    # Numerically-stable log-sum-exp over the class axis; no full (TILE_N, C)
    # log_probs temporary is materialized.
    m = jnp.max(x, axis=1, keepdims=True)               # (TILE_N, 1)
    shifted = x - m                                      # (TILE_N, C)
    sum_exp = jnp.sum(jnp.exp(shifted), axis=1, keepdims=True)   # (TILE_N, 1)
    lse = jnp.log(sum_exp)                               # (TILE_N, 1)

    # "gather(1, targets)" via masked select + row reduce (one where; no
    # convert + multiply per element).
    col = jax.lax.broadcasted_iota(jnp.int32, x.shape, 1)          # (TILE_N, C)
    shifted_t = jnp.sum(jnp.where(col == t, shifted, 0.0),
                        axis=1, keepdims=True)                      # (TILE_N, 1)

    ce = lse - shifted_t                                 # per-sample CE (= -log p_t)
    pt = jnp.exp(-ce)                                    # target prob (EUP exp)

    # Focal weight; integer-gamma fast paths avoid pow -> exp(gamma*log(x)).
    one_minus = 1.0 - pt
    g = float(gamma)
    if g == 2.0:
        w = one_minus * one_minus
    elif g == 1.0:
        w = one_minus
    elif g == 0.0:
        w = jnp.ones_like(one_minus)
    else:
        # pt can exceed 1.0 by an ulp -> clamp so x**gamma never goes NaN.
        w = jnp.maximum(one_minus, 0.0) ** g

    focal = w * ce                                       # (TILE_N, 1)
    if float(alpha) != 1.0:
        focal = alpha * focal

    if reduction in ('mean', 'sum'):
        # Rows past n_valid belong to the (unpadded) boundary block: mask them out
        # of the partial sum.  jnp.where selects, so any NaN/Inf from the garbage
        # boundary rows does not propagate.
        row = i * tile_n + jax.lax.broadcasted_iota(jnp.int32, (tile_n, 1), 0)
        focal = jnp.where(row < n_valid, focal, 0.0)
        out_ref[...] = jnp.sum(focal).reshape(1, 1, 1)   # per-block partial sum
    else:
        # Lane-dense per-sample losses (last dim = TILE_N, not 1).  Boundary-block
        # garbage rows are sliced away in the wrapper.
        out_ref[...] = focal.reshape(1, 1, tile_n)


def _choose_tile_n(n_rows, n_classes, itemsize):
    """Largest row-tile whose full working set fits the scoped-VMEM limit."""
    c_pad = max(128, _round_up(n_classes, 128))          # lane padding of logits block
    # Per-row VMEM: double-buffered logits blocks + ~2x f32 (tile, c_pad) live temps
    # (shifted + exp/where temp) + double-buffered lane-padded int32 targets block.
    per_row = 2 * c_pad * itemsize + 2 * c_pad * 4 + 2 * 128 * 4
    budget = int((32 << 20) * 0.8)                       # 32 MiB limit, ~20% margin
    tile = budget // per_row
    tile = max(8, min(2048, (tile // 8) * 8))
    # Keep >= 2 grid blocks so v7x's second TensorCore gets work on the "parallel"
    # batch axis (harmless on single-TC v5e/v6e).
    two_core_cap = max(8, _round_up(pl.cdiv(n_rows, 2), 8))
    return min(tile, two_core_cap)


def focal_loss(logits, targets, alpha=1.0, gamma=2.0, reduction='mean', tile_n=None):
    """Pallas TPU focal loss. logits: (N, C) float (f32 or bf16), targets: (N,) int."""
    n, c = logits.shape
    itemsize = jnp.dtype(logits.dtype).itemsize

    if tile_n is None:
        tile_n = _choose_tile_n(n, c, itemsize)
    else:
        tile_n = max(8, _round_up(int(tile_n), 8))

    num_blocks = pl.cdiv(n, tile_n)

    # No wrapper-side jnp.pad: the partial boundary block is handled by Pallas'
    # boundary-block reads + the in-kernel mask (mean/sum) / the [:n] slice (none).
    targets2d = targets.astype(jnp.int32).reshape(n, 1)

    kernel = functools.partial(
        _focal_loss_kernel, alpha=float(alpha), gamma=float(gamma),
        reduction=reduction, n_valid=n, tile_n=tile_n)

    if reduction in ('mean', 'sum'):
        out_shape = jax.ShapeDtypeStruct((num_blocks, 1, 1), jnp.float32)
        out_spec = pl.BlockSpec((1, 1, 1), lambda i: (i, 0, 0))
        out_elems = num_blocks
    else:
        out_shape = jax.ShapeDtypeStruct((num_blocks, 1, tile_n), jnp.float32)
        out_spec = pl.BlockSpec((1, 1, tile_n), lambda i: (i, 0, 0))
        out_elems = num_blocks * tile_n

    cost = pl.CostEstimate(
        flops=7 * n * c,
        transcendentals=n * (c + 2),
        bytes_accessed=n * c * itemsize + n * 4 + out_elems * 4,
    )

    out = pl.pallas_call(
        kernel,
        out_shape=out_shape,
        grid=(num_blocks,),
        in_specs=[
            pl.BlockSpec((tile_n, c), lambda i: (i, 0)),   # logits tile
            pl.BlockSpec((tile_n, 1), lambda i: (i, 0)),   # targets tile
        ],
        out_specs=out_spec,
        compiler_params=pltpu.CompilerParams(
            dimension_semantics=("parallel",),
            vmem_limit_bytes=32 * 1024 * 1024,
        ),
        cost_estimate=cost,
    )(logits, targets2d)

    if reduction == 'mean':
        return jnp.sum(out) / jnp.float32(n)
    if reduction == 'sum':
        return jnp.sum(out)
    return out.reshape(num_blocks * tile_n)[:n]


def _reference_focal_loss(logits, targets, alpha=1.0, gamma=2.0, reduction='mean'):
    """Plain-JAX reference mirroring the PyTorch forward."""
    logits = logits.astype(jnp.float32)
    probs = jax.nn.softmax(logits, axis=1)
    target_probs = jnp.take_along_axis(probs, targets[:, None], axis=1)[:, 0]
    focal_weight = (1.0 - target_probs) ** gamma
    log_probs = jax.nn.log_softmax(logits, axis=1)
    ce = -jnp.take_along_axis(log_probs, targets[:, None], axis=1)[:, 0]
    fl = alpha * focal_weight * ce
    if reduction == 'mean':
        return fl.mean()
    if reduction == 'sum':
        return fl.sum()
    return fl


if __name__ == "__main__":
    key = jax.random.PRNGKey(0)
    k1, k2 = jax.random.split(key)

    # N deliberately NOT a multiple of the forced tile -> exercises the unpadded
    # boundary block (masked partial sums / sliced 'none' output) and a
    # multi-block parallel grid.
    N, C = 200, 16
    logits = jax.random.normal(k1, (N, C), dtype=jnp.float32)
    targets = jax.random.randint(k2, (N,), 0, C, dtype=jnp.int32)

    for reduction in ("mean", "sum", "none"):
        out = focal_loss(logits, targets, alpha=1.0, gamma=2.0,
                         reduction=reduction, tile_n=64)
        out = jax.block_until_ready(out)
        ref = _reference_focal_loss(logits, targets, alpha=1.0, gamma=2.0,
                                    reduction=reduction)
        assert out.shape == ref.shape, (reduction, out.shape, ref.shape)
        assert jnp.allclose(out, ref, rtol=1e-5, atol=1e-5), (reduction, out, ref)

    # Fractional-gamma path (clamped (1-pt)**gamma).
    out_g = jax.block_until_ready(
        focal_loss(logits, targets, alpha=0.5, gamma=1.5, reduction="mean", tile_n=64))
    ref_g = _reference_focal_loss(logits, targets, alpha=0.5, gamma=1.5,
                                  reduction="mean")
    assert jnp.allclose(out_g, ref_g, rtol=1e-5, atol=1e-5), (out_g, ref_g)

    # Auto tile selection path (>=2 blocks for megacore) + bf16 inputs; looser tol.
    out_bf16 = jax.block_until_ready(
        focal_loss(logits.astype(jnp.bfloat16), targets, reduction="mean"))
    ref_bf16 = _reference_focal_loss(logits.astype(jnp.bfloat16), targets,
                                     reduction="mean")
    assert jnp.allclose(out_bf16, ref_bf16, rtol=2e-2, atol=2e-2), (out_bf16, ref_bf16)

    print("KERNEL_OK")
</pallas_src>

<mosaic_0001>
module attributes {stable_mosaic.version = 11 : i64} {
  func.func @_focal_loss_kernel(%arg0: i32, %arg1: memref<64x16xf32, #tpu.memory_space<vmem>>, %arg2: memref<64x1xi32, #tpu.memory_space<vmem>>, %arg3: memref<1x1x1xf32, #tpu.memory_space<vmem>>) attributes {dimension_semantics = [#tpu.dimension_semantics<parallel>], iteration_bounds = array<i64: 4>, scalar_prefetch = 0 : i64, scratch_operands = 0 : i64, tpu.core_type = #tpu.core_type<tc>, window_params = [{transform_indices = @transform_0, window_bounds = array<i64: 64, 16>}, {transform_indices = @transform_1, window_bounds = array<i64: 64, 1>}, {transform_indices = @transform_2, window_bounds = array<i64: 1, 1, 1>}]} {
    %c0 = arith.constant 0 : index
    %c0_0 = arith.constant 0 : index
    %0 = vector.load %arg1[%c0, %c0_0] : memref<64x16xf32, #tpu.memory_space<vmem>>, vector<64x16xf32>
    %c0_1 = arith.constant 0 : index
    %c0_2 = arith.constant 0 : index
    %1 = vector.load %arg2[%c0_1, %c0_2] : memref<64x1xi32, #tpu.memory_space<vmem>>, vector<64x1xi32>
    %cst = arith.constant dense<0xFF800000> : vector<64xf32>
    %2 = vector.multi_reduction <maximumf>, %0, %cst [1] : vector<64x16xf32> to vector<64xf32>
    %3 = vector.shape_cast %2 : vector<64xf32> to vector<64x1xf32>
    %4 = vector.broadcast %3 : vector<64x1xf32> to vector<64x16xf32>
    %5 = arith.subf %0, %4 : vector<64x16xf32>
    %6 = math.exp %5 : vector<64x16xf32>
    %cst_3 = arith.constant dense<0.000000e+00> : vector<64xf32>
    %7 = vector.multi_reduction <add>, %6, %cst_3 [1] : vector<64x16xf32> to vector<64xf32>
    %8 = vector.shape_cast %7 : vector<64xf32> to vector<64x1xf32>
    %9 = math.log %8 : vector<64x1xf32>
    %10 = tpu.iota {dimensions = array<i32: 1>} : vector<64x16xi32>
    %11 = vector.broadcast %1 : vector<64x1xi32> to vector<64x16xi32>
    %12 = arith.cmpi eq, %10, %11 : vector<64x16xi32>
    %cst_4 = arith.constant 0.000000e+00 : f32
    %13 = vector.broadcast %cst_4 : f32 to vector<64x16xf32>
    %14 = arith.select %12, %5, %13 : vector<64x16xi1>, vector<64x16xf32>
    %cst_5 = arith.constant dense<0.000000e+00> : vector<64xf32>
    %15 = vector.multi_reduction <add>, %14, %cst_5 [1] : vector<64x16xf32> to vector<64xf32>
    %16 = vector.shape_cast %15 : vector<64xf32> to vector<64x1xf32>
    %17 = arith.subf %9, %16 : vector<64x1xf32>
    %cst_6 = arith.constant 0.000000e+00 : f32
    %18 = vector.broadcast %cst_6 : f32 to vector<64x1xf32>
    %19 = arith.subf %18, %17 : vector<64x1xf32>
    %20 = math.exp %19 : vector<64x1xf32>
    %cst_7 = arith.constant 1.000000e+00 : f32
    %21 = vector.broadcast %cst_7 : f32 to vector<64x1xf32>
    %22 = arith.subf %21, %20 : vector<64x1xf32>
    %23 = arith.mulf %22, %22 : vector<64x1xf32>
    %24 = arith.mulf %23, %17 : vector<64x1xf32>
    %c64_i32 = arith.constant 64 : i32
    %25 = arith.muli %arg0, %c64_i32 : i32
    %26 = tpu.iota {dimensions = array<i32: 0>} : vector<64x1xi32>
    %27 = vector.broadcast %25 : i32 to vector<64x1xi32>
    %28 = arith.addi %27, %26 : vector<64x1xi32>
    %c200_i32 = arith.constant 200 : i32
    %29 = vector.broadcast %c200_i32 : i32 to vector<64x1xi32>
    %30 = arith.cmpi slt, %28, %29 : vector<64x1xi32>
    %cst_8 = arith.constant 0.000000e+00 : f32
    %31 = vector.broadcast %cst_8 : f32 to vector<64x1xf32>
    %32 = arith.select %30, %24, %31 : vector<64x1xi1>, vector<64x1xf32>
    %33 = vector.shape_cast %32 : vector<64x1xf32> to vector<1x64x1xf32>
    %cst_9 = arith.constant dense<0.000000e+00> : vector<1xf32>
    %34 = vector.multi_reduction <add>, %33, %cst_9 [1, 2] : vector<1x64x1xf32> to vector<1xf32>
    %35 = vector.shape_cast %34 : vector<1xf32> to vector<1x1x1xf32>
    %36 = vector.extract %35[0, 0, 0] : f32 from vector<1x1x1xf32>
    %37 = vector.broadcast %36 : f32 to vector<1x1x1xf32>
    %c0_10 = arith.constant 0 : index
    %c0_11 = arith.constant 0 : index
    %c0_12 = arith.constant 0 : index
    %38 = vector.load %arg3[%c0_10, %c0_11, %c0_12] : memref<1x1x1xf32, #tpu.memory_space<vmem>>, vector<1x1x1xf32>
    tpu.vector_store %arg3[%c0_10, %c0_11, %c0_12], %37 {strides = array<i32>} : memref<1x1x1xf32, #tpu.memory_space<vmem>>, vector<1x1x1xf32>,
    return
  }
  func.func @transform_0(%arg0: i32) -> (i32, i32) {
    %c0_i32 = arith.constant 0 : i32
    %c0_i32_0 = arith.constant 0 : i32
    return %arg0, %c0_i32 : i32, i32
  }
  func.func @transform_1(%arg0: i32) -> (i32, i32) {
    %c0_i32 = arith.constant 0 : i32
    %c0_i32_0 = arith.constant 0 : i32
    return %arg0, %c0_i32 : i32, i32
  }
  func.func @transform_2(%arg0: i32) -> (i32, i32, i32) {
    %c0_i32 = arith.constant 0 : i32
    %c0_i32_0 = arith.constant 0 : i32
    %c0_i32_1 = arith.constant 0 : i32
    return %arg0, %c0_i32, %c0_i32_0 : i32, i32, i32
  }
}

</mosaic_0001>

<bundles_post_ra>
// kernel: tpu_custom_call.1
= control target key start
LH: loop header
LB: loop body
LE: loop exit
PB: predicated region body
PF: predicated region fallthrough
CT: control target
= control target key end

     0   :  { %s650_s9 = smov 0   ;;  %s776_s0 = inlined_call_operand.vmem [shape: f32[200,16], index: 0, kind: input, shape index: {}]   ;;  %s777_s1 = inlined_call_operand.vmem [shape: s32[200,1], index: 1, kind: input, shape index: {}]   ;;  %s778_s2 = inlined_call_operand.vmem [shape: f32[4,1,1], index: 2, kind: output, shape index: {}]  }
   0x1 LB: > { %s656_s10 = sadd.s32 4294967295, %s632_s9   ;;  %p557_p0 = scmp.ge.s32.totalorder %s632_s9, 1  ;;  %s632_s9 = sphi %s650_s9, %s12_s9  }
   0x2   : > { %p140_p1 = scmp.lt.s32.totalorder %s632_s9, 5 }
   0x4   : > { %p141_p2 = pnand %p557_p0, %p140_p1 }
   0x5   : > { %s558_s11 = sshll.u32 (!%p141_p2), %s656_s10, 3  ;;  %v634_v0 = vmov (!%p141_p2), 0   ;;  %vm220_vm0 = vcmask (!%p141_p2), 130048   ;;  %v309_v53 = vlaneseq (!%p141_p2)  ;;  %s562_s19 = sshll.u32 (!%p141_p2), %s656_s10, 6  ;;  %vm466_vm11 = vcmask (!%p141_p2), 7168  }
   0x6   : > { %144 = sbr.rel (%p141_p2) target bundleno = 586 (0x24a), region = 28  ;;  %p178_p3 = scmp.lt.s32.totalorder (!%p141_p2), %s558_s11, 24  ;;  %577 = vset.pattern.permute.xlu1 (!%p141_p2), %v634_v0  ;;  %576 = vset.pattern.permute.xlu0 (!%p141_p2), %v634_v0 }
   0x7   : > { %v310_v60 = vand.u32 (!%p141_p2), 127, %v309_v53  ;;  %p201_p4 = scmp.lt.s32.totalorder (!%p141_p2), %s656_s10, 3 }
   0xd   : > { %s780_s11 = smov (!%p178_p3, %s558_s11), 24  ;;  %s782_s10 = smov (!%p201_p4, %s656_s10), 3 }
   0xe   : > { %s559_s12 = sshll.u32 %s780_s11, 3  ;;  %s203_s22 = scalar_lea.vmem %s778_s2, %s782_s10 }
   0xf   : > { %s181_s15 = scalar_lea.vmem %s776_s0, %s559_s12  ;;  %s195_s18 = scalar_lea.vmem %s777_s1, %s559_s12 }
  0x10   : > { %v206_v1 = vld [vmem:[%s181_s15 + $0x10] sm:$0xff]  ;;  %v204_v2 = vld [vmem:[%s181_s15] sm:$0xff]  ;;  %v207_v3 = vld [vmem:[%s181_s15 + $0x18] sm:$0xff] }
  0x11   : > { %v227_v4 = vsel %vm220_vm0, %v206_v1, -inf  ;;  %v221_v5 = vsel %vm220_vm0, %v204_v2, -inf  ;;  %v205_v6 = vld [vmem:[%s181_s15 + $0x8] sm:$0xff]  ;;  %v230_v7 = vsel %vm220_vm0, %v207_v3, -inf  ;;  %v208_v10 = vld [vmem:[%s181_s15 + $0x20] sm:$0xff]  ;;  %v211_v13 = vld [vmem:[%s181_s15 + $0x38] sm:$0xff] }
  0x12   : > { %228 = vmax.xlane.f32.xlu1 %v227_v4  ;;  %222 = vmax.xlane.f32.xlu0 %v221_v5  ;;  %v224_v8 = vsel %vm220_vm0, %v205_v6, -inf  ;;  %v209_v9 = vld [vmem:[%s181_s15 + $0x28] sm:$0xff]  ;;  %v233_v12 = vsel %vm220_vm0, %v208_v10, -inf  ;;  %v210_v14 = vld [vmem:[%s181_s15 + $0x30] sm:$0xff]  ;;  %v242_v15 = vsel %vm220_vm0, %v211_v13, -inf  ;;  %v212_v19 = vld [vmem:[%s195_s18] sm:$0xff] }
  0x13   : > { %v236_v11 = vsel %vm220_vm0, %v209_v9, -inf  ;;  %v239_v16 = vsel %vm220_vm0, %v210_v14, -inf  ;;  %v213_v17 = vld [vmem:[%s195_s18 + $0x8] sm:$0xff]  ;;  %v214_v18 = vld [vmem:[%s195_s18 + $0x10] sm:$0xff]  ;;  %v215_v20 = vld [vmem:[%s195_s18 + $0x18] sm:$0xff] }
  0x14   : > { %v216_v21 = vld [vmem:[%s195_s18 + $0x20] sm:$0xff]  ;;  %v217_v22 = vld [vmem:[%s195_s18 + $0x28] sm:$0xff]  ;;  %v218_v23 = vld [vmem:[%s195_s18 + $0x30] sm:$0xff] }
  0x15   : > { %v219_v24 = vld [vmem:[%s195_s18 + $0x38] sm:$0xff] }
  0x16   : > { %231 = vmax.xlane.f32.xlu1 %v230_v7  ;;  %225 = vmax.xlane.f32.xlu0 %v224_v8 }
  0x1a   : > { %237 = vmax.xlane.f32.xlu1 %v236_v11  ;;  %234 = vmax.xlane.f32.xlu0 %v233_v12 }
  0x1e   : > { %243 = vmax.xlane.f32.xlu1 %v242_v15  ;;  %240 = vmax.xlane.f32.xlu0 %v239_v16 }
  0x2f   : > { %315 = vperm.xlu1 %577, %v213_v17  }
  0x33   : > { %318 = vperm.xlu1 %577, %v214_v18  }
  0x34   : > { %312 = vperm.xlu0 %576, %v212_v19  }
  0x37   : > { %321 = vperm.xlu1 %577, %v215_v20  }
  0x3b   : > { %324 = vperm.xlu1 %577, %v216_v21  }
  0x3f   : > { %327 = vperm.xlu1 %577, %v217_v22  }
  0x43   : > { %330 = vperm.xlu1 %577, %v218_v23  }
  0x47   : > { %333 = vperm.xlu1 %577, %v219_v24  }
  0x9f   : > { %v229_v25 = vpop.xlane.xlu1 %228  ;;  %v223_v26 = vpop.xlane.xlu0 %222 }
  0xa0   : > { %v678_v27 = vsub.f32 %v204_v2, %v223_v26  ;;  %v681_v29 = vsub.f32 %v206_v1, %v229_v25 }
  0xa2   : > { %v253_v28 = vmul.f32 1.442695, %v678_v27  ;;  %v257_v36 = vmul.f32 1.442695, %v681_v29 }
  0xa3   : > { %v232_v30 = vpop.xlane.xlu1 %231  ;;  %v226_v31 = vpop.xlane.xlu0 %225 }
  0xa4   : > { %v683_v32 = vsub.f32 %v207_v3, %v232_v30  ;;  %v246_v33 = vsub.f32 %v205_v6, %v226_v31  ;;  %578 = vpow2.f32 %v253_v28 }
  0xa6   : > { %v259_v34 = vmul.f32 1.442695, %v683_v32  ;;  %v255_v35 = vmul.f32 1.442695, %v246_v33 }
  0xa7   : > { %v238_v37 = vpop.xlane.xlu1 %237  ;;  %v235_v38 = vpop.xlane.xlu0 %234 }
  0xa8   : > { %580 = vpow2.f32 %v259_v34  ;;  %v687_v39 = vsub.f32 %v209_v9, %v238_v37  ;;  %v689_v40 = vsub.f32 %v208_v10, %v235_v38 }
  0xa9   : > { %582 = vpow2.f32 %v255_v35 }
  0xaa   : > { %v263_v41 = vmul.f32 1.442695, %v687_v39  ;;  %v261_v42 = vmul.f32 1.442695, %v689_v40  ;;  %584 = vpow2.f32 %v257_v36 }
  0xab   : > { %v244_v43 = vpop.xlane.xlu1 %243  ;;  %v241_v44 = vpop.xlane.xlu0 %240 }
  0xac   : > { %586 = vpow2.f32 %v263_v41  ;;  %v693_v45 = vsub.f32 %v211_v13, %v244_v43  ;;  %v695_v46 = vsub.f32 %v210_v14, %v241_v44 }
  0xad   : > { %588 = vpow2.f32 %v261_v42 }
  0xae   : > { %v267_v47 = vmul.f32 1.442695, %v693_v45  ;;  %v265_v48 = vmul.f32 1.442695, %v695_v46  ;;  %v579_v49 = vpop.eup %578 }
  0xaf   : > { %v316_v50 = vpop.permute.xlu1 %315  ;;  %v269_v51 = vsel %vm220_vm0, %v579_v49, 0.0 }
  0xb0   : > { %590 = vpow2.f32 %v267_v47  ;;  %270 = vadd.xlane.f32.xlu1 %v269_v51  ;;  %vm336_vm1 = vcmp.eq.s32.totalorder %v310_v60, %v316_v50 }
  0xb1   : > { %592 = vpow2.f32 %v265_v48  ;;  %v344_v7 = vsel %vm336_vm1, %v246_v33, 0.0 }
  0xb2   : > { %v581_v52 = vpop.eup %580  ;;  %v354_v10 = vsel %vm220_vm0, %v344_v7, 0.0 }
  0xb3   : > { %v583_v54 = vpop.eup %582  ;;  %v319_v55 = vpop.permute.xlu1 %318  ;;  %v278_v56 = vsel %vm220_vm0, %v581_v52, 0.0 }
  0xb4   : > { %v272_v57 = vsel %vm220_vm0, %v583_v54, 0.0  ;;  %v585_v58 = vpop.eup %584  ;;  %279 = vadd.xlane.f32.xlu1 %v278_v56  ;;  %v313_v4 = vpop.permute.xlu0 %312  ;;  %vm337_vm4 = vcmp.eq.s32.totalorder %v310_v60, %v319_v55 }
  0xb5   : > { %273 = vadd.xlane.f32.xlu0 %v272_v57  ;;  %v275_v0 = vsel %vm220_vm0, %v585_v58, 0.0  ;;  %vm335_vm2 = vcmp.eq.s32.totalorder %v310_v60, %v313_v4  ;;  %v345_v17 = vsel %vm337_vm4, %v681_v29, 0.0 }
  0xb6   : > { %v587_v59 = vpop.eup %586  ;;  %v343_v12 = vsel %vm335_vm2, %v678_v27, 0.0  ;;  %v357_v20 = vsel %vm220_vm0, %v345_v17, 0.0  ;;  %vm492_vm2 = vcmask 0  }
  0xb7   : > { %v589_v61 = vpop.eup %588  ;;  %v322_v62 = vpop.permute.xlu1 %321  ;;  %v284_v63 = vsel %vm220_vm0, %v587_v59, 0.0  ;;  %v351_v15 = vsel %vm220_vm0, %v343_v12, 0.0 }
  0xb8   : > { %285 = vadd.xlane.f32.xlu1 %v284_v63  ;;  %v281_v2 = vsel %vm220_vm0, %v589_v61, 0.0  ;;  %vm338_vm3 = vcmp.eq.s32.totalorder %v310_v60, %v322_v62 }
  0xb9   : > { %276 = vadd.xlane.f32.xlu0 %v275_v0  ;;  %v346_v11 = vsel %vm338_vm3, %v683_v32, 0.0 }
  0xba   : > { %v591_v1 = vpop.eup %590  ;;  %v360_v14 = vsel %vm220_vm0, %v346_v11, 0.0 }
  0xbb   : > { %v593_v3 = vpop.eup %592  ;;  %v325_v5 = vpop.permute.xlu1 %324  ;;  %v290_v6 = vsel %vm220_vm0, %v591_v1, 0.0 }
  0xbc   : > { %291 = vadd.xlane.f32.xlu1 %v290_v6  ;;  %v287_v8 = vsel %vm220_vm0, %v593_v3, 0.0  ;;  %vm339_vm6 = vcmp.eq.s32.totalorder %v310_v60, %v325_v5 }
  0xbd   : > { %282 = vadd.xlane.f32.xlu0 %v281_v2  ;;  %v347_v22 = vsel %vm339_vm6, %v689_v40, 0.0 }
  0xbe   : > { %v363_v24 = vsel %vm220_vm0, %v347_v22, 0.0 }
  0xbf   : > { %v328_v9 = vpop.permute.xlu1 %327 }
  0xc0   : > { %355 = vadd.xlane.f32.xlu1 %v354_v10  ;;  %vm340_vm5 = vcmp.eq.s32.totalorder %v310_v60, %v328_v9  ;;  %v433_v10 = vshrl.u32 %v309_v53, 7 }
  0xc1   : > { %288 = vadd.xlane.f32.xlu0 %v287_v8  ;;  %v348_v16 = vsel %vm340_vm5, %v687_v39, 0.0 }
  0xc2   : > { %v366_v19 = vsel %vm220_vm0, %v348_v16, 0.0 }
  0xc3   : > { %v331_v13 = vpop.permute.xlu1 %330 }
  0xc4   : > { %361 = vadd.xlane.f32.xlu1 %v360_v14  ;;  %vm341_vm8 = vcmp.eq.s32.totalorder %v310_v60, %v331_v13 }
  0xc5   : > { %352 = vadd.xlane.f32.xlu0 %v351_v15  ;;  %v349_v25 = vsel %vm341_vm8, %v695_v46, 0.0 }
  0xc6   : > { %v369_v26 = vsel %vm220_vm0, %v349_v25, 0.0  ;;  %v435_v25 = vadd.s32 16, %v433_v10 }
  0xc7   : > { %v334_v18 = vpop.permute.xlu1 %333 }
  0xc8   : > { %vm342_vm7 = vcmp.eq.s32.totalorder %v310_v60, %v334_v18  ;;  %367 = vadd.xlane.f32.xlu1 %v366_v19  ;;  %v434_v19 = vadd.s32 8, %v433_v10 }
  0xc9   : > { %358 = vadd.xlane.f32.xlu0 %v357_v20  ;;  %v350_v21 = vsel %vm342_vm7, %v693_v45, 0.0 }
  0xca   : > { %v372_v23 = vsel %vm220_vm0, %v350_v21, 0.0  ;;  %v441_v21 = vstv %s562_s19 }
  0xcc   : > { %373 = vadd.xlane.f32.xlu1 %v372_v23  ;;  %v436_v23 = vadd.s32 24, %v433_v10 }
  0xcd   : > { %364 = vadd.xlane.f32.xlu0 %v363_v24 }
  0xd1   : > { %370 = vadd.xlane.f32.xlu0 %v369_v26 }
 0x13d   : > { %v271_v27 = vpop.xlane.xlu1 %270 }
 0x13e   : > { %594 = vlog2.f32 %v271_v27 }
 0x141   : > { %v280_v28 = vpop.xlane.xlu1 %279 }
 0x142   : > { %v274_v29 = vpop.xlane.xlu0 %273  ;;  %596 = vlog2.f32 %v280_v28  ;;  %v443_v28 = vadd.s32 %v441_v21, %v434_v19 }
 0x143   : > { %598 = vlog2.f32 %v274_v29 }
 0x144   : > { %vm451_vm9 = vcmp.lt.s32.totalorder %v443_v28, 200 }
 0x145   : > { %v286_v30 = vpop.xlane.xlu1 %285 }
 0x146   : > { %v277_v31 = vpop.xlane.xlu0 %276  ;;  %600 = vlog2.f32 %v286_v30 }
 0x147   : > { %602 = vlog2.f32 %v277_v31  ;;  %v442_v31 = vadd.s32 %v441_v21, %v433_v10 }
 0x148   : > { %v595_v34 = vpop.eup %594 }
 0x149   : > { %v292_v32 = vpop.xlane.xlu1 %291  ;;  %v294_v43 = vmul.f32 0.6931472, %v595_v34  ;;  %v445_v34 = vadd.s32 %v441_v21, %v436_v23  ;;  %vm450_vm10 = vcmp.lt.s32.totalorder %v442_v31, 200 }
 0x14a   : > { %v283_v33 = vpop.xlane.xlu0 %282  ;;  %604 = vlog2.f32 %v292_v32 }
 0x14b   : > { %606 = vlog2.f32 %v283_v33  ;;  %v438_v33 = vadd.s32 40, %v433_v10  ;;  %vm453_vm12 = vcmp.lt.s32.totalorder %v445_v34, 200 }
 0x14c   : > { %v597_v35 = vpop.eup %596 }
 0x14d   : > { %v599_v36 = vpop.eup %598  ;;  %v356_v37 = vpop.xlane.xlu1 %355  ;;  %v300_v40 = vmul.f32 0.6931472, %v597_v35 }
 0x14e   : > { %v289_v38 = vpop.xlane.xlu0 %288  ;;  %v296_v39 = vmul.f32 0.6931472, %v599_v36 }
 0x14f   : > { %608 = vlog2.f32 %v289_v38 }
 0x150   : > { %v601_v41 = vpop.eup %600  ;;  %v723_v42 = vsub.f32 %v296_v39, %v356_v37  ;;  %v444_v39 = vadd.s32 %v441_v21, %v435_v25 }
 0x151   : > { %v362_v44 = vpop.xlane.xlu1 %361  ;;  %v603_v46 = vpop.eup %602  ;;  %v304_v50 = vmul.f32 0.6931472, %v601_v41 }
 0x152   : > { %v353_v45 = vpop.xlane.xlu0 %352  ;;  %v384_v47 = vsub.f32 0.0, %v723_v42  ;;  %v726_v48 = vsub.f32 %v300_v40, %v362_v44  ;;  %v298_v58 = vmul.f32 0.6931472, %v603_v46  ;;  %vm452_vm13 = vcmp.lt.s32.totalorder %v444_v39, 200 }
 0x153   : > { %v728_v49 = vsub.f32 %v294_v43, %v353_v45  ;;  %v437_v43 = vadd.s32 32, %v433_v10  ;;  %v447_v45 = vadd.s32 %v441_v21, %v438_v33 }
 0x154   : > { %v605_v51 = vpop.eup %604  ;;  %v393_v52 = vmul.f32 1.442695, %v384_v47  ;;  %v386_v54 = vsub.f32 0.0, %v726_v48 }
 0x155   : > { %v383_v55 = vsub.f32 0.0, %v728_v49  ;;  %v607_v56 = vpop.eup %606  ;;  %v368_v57 = vpop.xlane.xlu1 %367  ;;  %v308_v60 = vmul.f32 0.6931472, %v605_v51  ;;  %v439_v51 = vadd.s32 48, %v433_v10  ;;  %vm455_vm14 = vcmp.lt.s32.totalorder %v447_v45, 200 }
 0x156   : > { %v359_v59 = vpop.xlane.xlu0 %358  ;;  %610 = vpow2.f32 %v393_v52  ;;  %v397_v61 = vmul.f32 1.442695, %v386_v54  ;;  %v732_v63 = vsub.f32 %v304_v50, %v368_v57  ;;  %v302_v2 = vmul.f32 0.6931472, %v607_v56 }
 0x157   : > { %v391_v62 = vmul.f32 1.442695, %v383_v55  ;;  %v734_v0 = vsub.f32 %v298_v58, %v359_v59  ;;  %v446_v59 = vadd.s32 %v441_v21, %v437_v43 }
 0x158   : > { %612 = vpow2.f32 %v397_v61  ;;  %v388_v1 = vsub.f32 0.0, %v732_v63 }
 0x159   : > { %v609_v3 = vpop.eup %608  ;;  %614 = vpow2.f32 %v391_v62  ;;  %v385_v4 = vsub.f32 0.0, %v734_v0  ;;  %v374_v5 = vpop.xlane.xlu1 %373  ;;  %vm454_vm15 = vcmp.lt.s32.totalorder %v446_v59, 200 }
 0x15a   : > { %v365_v6 = vpop.xlane.xlu0 %364  ;;  %v401_v7 = vmul.f32 1.442695, %v388_v1  ;;  %v738_v8 = vsub.f32 %v308_v60, %v374_v5  ;;  %v306_v14 = vmul.f32 0.6931472, %v609_v3  ;;  %v440_v60 = vadd.s32 56, %v433_v10 }
 0x15b   : > { %v740_v9 = vsub.f32 %v302_v2, %v365_v6  ;;  %v395_v11 = vmul.f32 1.442695, %v385_v4  ;;  %v448_v2 = vadd.s32 %v441_v21, %v439_v51 }
 0x15c   : > { %616 = vpow2.f32 %v401_v7  ;;  %v390_v12 = vsub.f32 0.0, %v738_v8 }
 0x15d   : > { %v387_v13 = vsub.f32 0.0, %v740_v9  ;;  %618 = vpow2.f32 %v395_v11  ;;  %vm456_vm0 = vcmp.lt.s32.totalorder %v448_v2, 200 }
 0x15e   : > { %v371_v15 = vpop.xlane.xlu0 %370  ;;  %v405_v16 = vmul.f32 1.442695, %v390_v12  ;;  %v449_v12 = vadd.s32 %v441_v21, %v440_v60 }
 0x15f   : > { %v399_v17 = vmul.f32 1.442695, %v387_v13  ;;  %v746_v18 = vsub.f32 %v306_v14, %v371_v15 }
 0x160   : > { %v611_v20 = vpop.eup %610  ;;  %620 = vpow2.f32 %v405_v16  ;;  %vm457_vm1 = vcmp.lt.s32.totalorder %v449_v12, 200 }
 0x161   : > { %v389_v53 = vsub.f32 0.0, %v746_v18  ;;  %v408_v22 = vsub.f32 1.0, %v611_v20  ;;  %622 = vpow2.f32 %v399_v17 }
 0x162   : > { %v613_v24 = vpop.eup %612 }
 0x163   : > { %v403_v26 = vmul.f32 1.442695, %v389_v53  ;;  %v615_v27 = vpop.eup %614  ;;  %v416_v29 = vmul.f32 %v408_v22, %v408_v22  ;;  %v410_v30 = vsub.f32 1.0, %v613_v24 }
 0x164   : > { %v407_v32 = vsub.f32 1.0, %v615_v27 }
 0x165   : > { %624 = vpow2.f32 %v403_v26  ;;  %v418_v35 = vmul.f32 %v410_v30, %v410_v30  ;;  %v424_v37 = vmul.f32 %v416_v29, %v723_v42 }
 0x166   : > { %v617_v36 = vpop.eup %616  ;;  %v415_v38 = vmul.f32 %v407_v32, %v407_v32 }
 0x167   : > { %v619_v40 = vpop.eup %618  ;;  %v412_v41 = vsub.f32 1.0, %v617_v36  ;;  %v426_v47 = vmul.f32 %v418_v35, %v726_v48  ;;  %v459_v54 = vsel %vm451_vm9, %v424_v37, 0.0 }
 0x168   : > { %v423_v44 = vmul.f32 %v415_v38, %v728_v49  ;;  %v409_v46 = vsub.f32 1.0, %v619_v40  ;;  %v468_v62 = vsel %vm466_vm11, %v459_v54, 0.0 }
 0x169   : > { %v420_v50 = vmul.f32 %v412_v41, %v412_v41  ;;  %v461_v48 = vsel %vm453_vm12, %v426_v47, 0.0 }
 0x16a   : > { %v621_v52 = vpop.eup %620  ;;  %v458_v42 = vsel %vm450_vm10, %v423_v44, 0.0  ;;  %v417_v55 = vmul.f32 %v409_v46, %v409_v46  ;;  %v472_v14 = vsel %vm466_vm11, %v461_v48, 0.0 }
 0x16b   : > { %v623_v56 = vpop.eup %622  ;;  %v467_v57 = vsel %vm466_vm11, %v458_v42, 0.0  ;;  %v414_v58 = vsub.f32 1.0, %v621_v52  ;;  %v428_v1 = vmul.f32 %v420_v50, %v732_v63 }
 0x16c   : > { %v425_v49 = vmul.f32 %v417_v55, %v734_v0  ;;  %v411_v61 = vsub.f32 1.0, %v623_v56  ;;  %v469_v4 = vadd.f32 %v468_v62, %v467_v57 }
 0x16d   : > { %v422_v6 = vmul.f32 %v414_v58, %v414_v58  ;;  %v463_v63 = vsel %vm455_vm14, %v428_v1, 0.0 }
 0x16e   : > { %v460_v5 = vsel %vm452_vm13, %v425_v49, 0.0  ;;  %v419_v7 = vmul.f32 %v411_v61, %v411_v61  ;;  %v476_v21 = vsel %vm466_vm11, %v463_v63, 0.0 }
 0x16f   : > { %v625_v3 = vpop.eup %624  ;;  %v470_v11 = vsel %vm466_vm11, %v460_v5, 0.0  ;;  %v430_v16 = vmul.f32 %v422_v6, %v738_v8 }
 0x170   : > { %v413_v10 = vsub.f32 1.0, %v625_v3  ;;  %v471_v0 = vadd.f32 %v470_v11, %v469_v4  ;;  %v427_v13 = vmul.f32 %v419_v7, %v740_v9 }
 0x171   : > { %v465_v9 = vsel %vm457_vm1, %v430_v16, 0.0 }
 0x172   : > { %v421_v15 = vmul.f32 %v413_v10, %v413_v10  ;;  %v473_v17 = vadd.f32 %v472_v14, %v471_v0  ;;  %v462_v19 = vsel %vm454_vm15, %v427_v13, 0.0  ;;  %v480_v8 = vsel %vm466_vm11, %v465_v9, 0.0 }
 0x173   : > { %v474_v20 = vsel %vm466_vm11, %v462_v19, 0.0 }
 0x174   : > { %v429_v53 = vmul.f32 %v421_v15, %v746_v18  ;;  %v475_v22 = vadd.f32 %v474_v20, %v473_v17 }
 0x176   : > { %v464_v23 = vsel %vm456_vm0, %v429_v53, 0.0  ;;  %v477_v24 = vadd.f32 %v476_v21, %v475_v22 }
 0x177   : > { %v478_v25 = vsel %vm466_vm11, %v464_v23, 0.0 }
 0x178   : > { %v479_v26 = vadd.f32 %v478_v25, %v477_v24 }
 0x17a   : > { %v481_v27 = vadd.f32 %v480_v8, %v479_v26 }
 0x17c   : > { %482 = vadd.xlane.f32.xlu0 %v481_v27 }
 0x209   : > { %v483_v28 = vpop.xlane.xlu0 %482 }
 0x20a   : > { %v484_v29 = vrot.slane %v483_v28, 4 }
 0x20c   : > { %v485_v30 = vadd.f32 %v484_v29, %v483_v28 }
 0x20e   : > { %v486_v18 = vrot.slane %v485_v30, 2 }
 0x210   : > { %v487_v31 = vadd.f32 %v486_v18, %v485_v30 }
 0x212   : > { %v488_v32 = vrot.slane %v487_v31, 1 }
 0x214   : > { %v489_v33 = vadd.f32 %v488_v32, %v487_v31 }
 0x216   : > { %565 = vpush %v489_v33 }
 0x247   : > { %s566_s23 = spop %565 }
 0x248   : > { %v491_v34 = vstv %s566_s23 }
 0x249   : > { %493 = vst.msk [vmem:[%s203_s22] sm:$0x1] %vm492_vm2, %v491_v34 }
 0x24a PF: > { %s12_s9 = sadd.s32 1, %s632_s9  }
 0x24b   : > { %p9_p5 = scmp.ge.s32.totalorder %s12_s9, 6  }
 0x24d   :  { %11 = sbr.rel (!%p9_p5) target bundleno = 1 (0x1), region = 61 }

</bundles_post_ra>
